<compile_context>
chip_gen: v5e
topology: v5e:2x2
jax: 0.10.0
libtpu: 0.0.40
codegen_flags: <defaults>
</compile_context>

<pallas_src>
import functools

import jax
import jax.numpy as jnp
from jax.experimental import pallas as pl
from jax.experimental.pallas import tpu as pltpu


def _round_up(x, m):
    return ((x + m - 1) // m) * m


def _cdiv(a, b):
    return (a + b - 1) // b


# ----------------------------- Pallas kernel --------------------------------
def _proj_kernel(p_ref, w_ref, b_ref, o_ref):
    # p_ref: (tm, K)   im2col patch rows (compute dtype)
    # w_ref: (K, Np)   flattened conv weight slab, VMEM-resident across grid
    # b_ref: (1, Np)   f32 bias row, VMEM-resident across grid
    # o_ref: (tm, Np)  projected patches
    acc = jnp.dot(p_ref[...], w_ref[...], preferred_element_type=jnp.float32)
    o_ref[...] = (acc + b_ref[...]).astype(o_ref.dtype)


def _proj_matmul(patches, w_flat, bias_row, out_dtype, tm):
    """(M, K) @ (K, Np) + bias -> (M, Np). 1-D grid over M, weights resident."""
    M, K = patches.shape
    _, Np = w_flat.shape
    assert Np % 128 == 0

    grid = (_cdiv(M, tm),)

    # Advisory cost estimate so XLA schedules surrounding glue sensibly.
    in_bytes = (patches.size * patches.dtype.itemsize
                + w_flat.size * w_flat.dtype.itemsize
                + bias_row.size * bias_row.dtype.itemsize)
    out_bytes = M * Np * jnp.dtype(out_dtype).itemsize
    cost = pl.CostEstimate(flops=2 * M * K * Np,
                           transcendentals=0,
                           bytes_accessed=in_bytes + out_bytes)

    # VMEM budget: double-buffered patch/output tiles + resident weight/bias,
    # 2x headroom, capped inside v7x's 64 MiB physical VMEM.
    tile_bytes = (2 * tm * K * patches.dtype.itemsize
                  + 2 * K * Np * w_flat.dtype.itemsize
                  + 2 * Np * bias_row.dtype.itemsize
                  + 2 * tm * Np * jnp.dtype(out_dtype).itemsize)
    vmem_limit = int(min(max(2 * tile_bytes, 16 << 20), 48 << 20))

    return pl.pallas_call(
        _proj_kernel,
        out_shape=jax.ShapeDtypeStruct((M, Np), out_dtype),
        grid=grid,
        in_specs=[
            pl.BlockSpec((tm, K), lambda i: (i, 0)),
            pl.BlockSpec((K, Np), lambda i: (0, 0)),   # resident across grid
            pl.BlockSpec((1, Np), lambda i: (0, 0)),   # resident across grid
        ],
        out_specs=pl.BlockSpec((tm, Np), lambda i: (i, 0)),
        compiler_params=pltpu.CompilerParams(
            dimension_semantics=("parallel",),
            vmem_limit_bytes=vmem_limit),
        cost_estimate=cost,
    )(patches, w_flat, bias_row)


# ----------------------------- module wrapper --------------------------------
def overlap_patch_embed(x, weight, bias, stride, *, tm=512,
                        compute_dtype=jnp.bfloat16):
    """Forward pass of OverlapPatchEmbed.

    x:      (B, C_in, H, W)          NCHW, like PyTorch
    weight: (C_out, C_in, k, k)      PyTorch Conv2d weight layout
    bias:   (C_out,)
    returns (B, num_patches, C_out)  == conv2d(x).flatten(2).transpose(1,2)

    compute_dtype: MXU input dtype (default bf16; accumulation stays f32).
    Set to None to keep the input dtype end-to-end.
    """
    B, C_in, H, W = x.shape
    C_out, _, kH, kW = weight.shape
    # padding=0, dilation=1, groups=1 (the Conv2d handed to this module)
    Ho = (H - kH) // stride + 1
    Wo = (W - kW) // stride + 1
    M = B * Ho * Wo
    K = kH * kW * C_in
    out_dtype = x.dtype

    # Cast *before* the im2col so the materialized patches tensor (the largest
    # intermediate) is already in the compute dtype.
    if compute_dtype is not None:
        x = x.astype(compute_dtype)
        weight = weight.astype(compute_dtype)

    # ---- im2col, transpose-free: NHWC with K ordered (kh, kw, c_in) ----
    x_nhwc = jnp.transpose(x, (0, 2, 3, 1))                 # (B, H, W, C_in)
    cols = jnp.stack(
        [jnp.stack(
            [x_nhwc[:, kh:kh + stride * Ho:stride,
                    kw:kw + stride * Wo:stride, :]
             for kw in range(kW)], axis=3)
         for kh in range(kH)], axis=3)       # (B, Ho, Wo, kH, kW, C_in)
    patches = cols.reshape(M, K)             # plain reshape; no pad, no transpose

    # Weight flattened with the same K order; only N is padded (lane-dense
    # output stores). Bias stays f32 for the epilogue.
    Np = _round_up(C_out, 128)
    w_flat = jnp.transpose(weight, (2, 3, 1, 0)).reshape(K, C_out)
    w_p = jnp.pad(w_flat, ((0, 0), (0, Np - C_out)))
    b_p = jnp.pad(bias.astype(jnp.float32), (0, Np - C_out)).reshape(1, Np)

    # Tile size over M: multiple of 16 (bf16 sublane packing). If one tile
    # covers all of M, use M exactly (block == full dim, no masked tail).
    tm_eff = M if M <= tm else _round_up(tm, 16)

    # ---- hot path: tiled matmul + bias in Pallas ----
    out = _proj_matmul(patches, w_p, b_p, out_dtype, tm_eff)   # (M, Np)

    # TODO(synk): fold the im2col into the kernel (x in pl.ANY HBM + per-tile
    # async_copy of strided row bands) to remove the M*K patches
    # materialization and the kH*kW/stride^2 HBM read amplification.

    # Un-pad N; equivalent of conv(...).flatten(2).transpose(1, 2)
    return out[:, :C_out].reshape(B, Ho * Wo, C_out)


# --------------------------------- main --------------------------------------
if __name__ == "__main__":
    # Small shapes consistent with the module:
    #   img_size=16, patch_size=4, overlap=2  -> stride=2
    #   num_patches = ((16-2)//(4-2))**2 = 49
    #   proj = Conv2d(in=4, out=32, kernel=4, stride=2, padding=0)
    B, C_in, IMG = 2, 4, 16
    PATCH, OVERLAP, C_OUT = 4, 2, 32
    STRIDE = PATCH - OVERLAP

    key = jax.random.PRNGKey(0)
    kx, kw, kb = jax.random.split(key, 3)
    x = jax.random.normal(kx, (B, C_in, IMG, IMG), dtype=jnp.float32)
    weight = jax.random.normal(kw, (C_OUT, C_in, PATCH, PATCH),
                               dtype=jnp.float32) * 0.05
    bias = jax.random.normal(kb, (C_OUT,), dtype=jnp.float32) * 0.05

    # Reference: F.conv2d semantics (NCHW/OIHW), then flatten(2).transpose(1,2).
    ref = jax.lax.conv_general_dilated(
        x, weight, window_strides=(STRIDE, STRIDE), padding="VALID",
        dimension_numbers=("NCHW", "OIHW", "NCHW"))
    ref = ref + bias.reshape(1, C_OUT, 1, 1)
    ref = jnp.transpose(ref.reshape(B, C_OUT, -1), (0, 2, 1))  # (B, N, C_out)

    n_patches = ((IMG - OVERLAP) // STRIDE) ** 2

    # f32 compute path: tight tolerance.
    fwd_f32 = jax.jit(functools.partial(overlap_patch_embed, stride=STRIDE,
                                        compute_dtype=None))
    y32 = jax.block_until_ready(fwd_f32(x, weight, bias))
    assert y32.shape == (B, n_patches, C_OUT), y32.shape
    assert jnp.allclose(y32, ref, atol=1e-4, rtol=1e-4), \
        float(jnp.max(jnp.abs(y32 - ref)))

    # Default bf16 compute path: looser tolerance (inputs rounded to bf16).
    fwd = jax.jit(functools.partial(overlap_patch_embed, stride=STRIDE))
    y = jax.block_until_ready(fwd(x, weight, bias))
    assert y.shape == (B, n_patches, C_OUT), y.shape
    assert jnp.allclose(y, ref, atol=5e-2, rtol=5e-2), \
        float(jnp.max(jnp.abs(y - ref)))

    print("KERNEL_OK")
</pallas_src>

<mosaic_0001>
module attributes {stable_mosaic.version = 11 : i64} {
  func.func @_proj_kernel(%arg0: i32, %arg1: memref<98x64xf32, #tpu.memory_space<vmem>>, %arg2: memref<64x128xf32, #tpu.memory_space<vmem>>, %arg3: memref<1x128xf32, #tpu.memory_space<vmem>>, %arg4: memref<98x128xf32, #tpu.memory_space<vmem>>) attributes {dimension_semantics = [#tpu.dimension_semantics<parallel>], iteration_bounds = array<i64: 1>, scalar_prefetch = 0 : i64, scratch_operands = 0 : i64, tpu.core_type = #tpu.core_type<tc>, window_params = [{transform_indices = @transform_0, window_bounds = array<i64: 98, 64>}, {pipeline_mode = #tpu.pipeline_mode<synchronous>, transform_indices = @transform_1, window_bounds = array<i64: 64, 128>}, {pipeline_mode = #tpu.pipeline_mode<synchronous>, transform_indices = @transform_2, window_bounds = array<i64: 1, 128>}, {transform_indices = @transform_3, window_bounds = array<i64: 98, 128>}]} {
    %c0 = arith.constant 0 : index
    %c0_0 = arith.constant 0 : index
    %0 = vector.load %arg1[%c0, %c0_0] : memref<98x64xf32, #tpu.memory_space<vmem>>, vector<98x64xf32>
    %c0_1 = arith.constant 0 : index
    %c0_2 = arith.constant 0 : index
    %1 = vector.load %arg2[%c0_1, %c0_2] : memref<64x128xf32, #tpu.memory_space<vmem>>, vector<64x128xf32>
    %cst = arith.constant dense<0.000000e+00> : vector<98x128xf32>
    %2 = tpu.matmul %0, %1, %cst {dimension_numbers = #tpu.dot_dimension_numbers<[1], [0], [0], [1], [0, 0, 1, 1], [], []>} : vector<98x64xf32>, vector<64x128xf32>, vector<98x128xf32> -> vector<98x128xf32>
    %c0_3 = arith.constant 0 : index
    %c0_4 = arith.constant 0 : index
    %3 = vector.load %arg3[%c0_3, %c0_4] : memref<1x128xf32, #tpu.memory_space<vmem>>, vector<1x128xf32>
    %4 = vector.broadcast %3 : vector<1x128xf32> to vector<98x128xf32>
    %5 = arith.addf %2, %4 : vector<98x128xf32>
    %c0_5 = arith.constant 0 : index
    %c0_6 = arith.constant 0 : index
    %6 = vector.load %arg4[%c0_5, %c0_6] : memref<98x128xf32, #tpu.memory_space<vmem>>, vector<98x128xf32>
    tpu.vector_store %arg4[%c0_5, %c0_6], %5 {strides = array<i32>} : memref<98x128xf32, #tpu.memory_space<vmem>>, vector<98x128xf32>,
    return
  }
  func.func @transform_0(%arg0: i32) -> (i32, i32) {
    %c0_i32 = arith.constant 0 : i32
    %c0_i32_0 = arith.constant 0 : i32
    return %arg0, %c0_i32 : i32, i32
  }
  func.func @transform_1(%arg0: i32) -> (i32, i32) {
    %c0_i32 = arith.constant 0 : i32
    %c0_i32_0 = arith.constant 0 : i32
    %c0_i32_1 = arith.constant 0 : i32
    return %c0_i32, %c0_i32_0 : i32, i32
  }
  func.func @transform_2(%arg0: i32) -> (i32, i32) {
    %c0_i32 = arith.constant 0 : i32
    %c0_i32_0 = arith.constant 0 : i32
    %c0_i32_1 = arith.constant 0 : i32
    return %c0_i32, %c0_i32_0 : i32, i32
  }
  func.func @transform_3(%arg0: i32) -> (i32, i32) {
    %c0_i32 = arith.constant 0 : i32
    %c0_i32_0 = arith.constant 0 : i32
    return %arg0, %c0_i32 : i32, i32
  }
}

</mosaic_0001>

<bundles_post_ra>
// kernel: overlap_patch_embed.1
= control target key start
LH: loop header
LB: loop body
LE: loop exit
PB: predicated region body
PF: predicated region fallthrough
CT: control target
= control target key end

     0   :  { %vm39_vm0 = vcmask 523264   ;;  %s328_s1 = inlined_call_operand.vmem [shape: f32[64,128], index: 1, kind: input, shape index: {}]   ;;  %s329_s2 = inlined_call_operand.vmem [shape: f32[1,128], index: 2, kind: input, shape index: {}]   ;;  %s330_s0 = inlined_call_operand.vmem [shape: f32[98,64], index: 0, kind: input, shape index: {}]   ;;  %s331_s3 = inlined_call_operand.vmem [shape: f32[98,128], index: 3, kind: output, shape index: {}]  }
   0x1   :  { %v34_v0 = vld [vmem:[%s328_s1 + $0x38] sm:$0xff]  ;;  %v33_v1 = vld [vmem:[%s328_s1 + $0x30] sm:$0xff]  ;;  %v32_v2 = vld [vmem:[%s328_s1 + $0x28] sm:$0xff] }
   0x2   :  { %166 = vmatpush.msra.mxu2 %v34_v0  ;;  %167 = vmatpush.msra.mxu3 %v34_v0  ;;  %v31_v3 = vld [vmem:[%s328_s1 + $0x20] sm:$0xff]  ;;  %v30_v4 = vld [vmem:[%s328_s1 + $0x18] sm:$0xff]  ;;  %v29_v5 = vld [vmem:[%s328_s1 + $0x10] sm:$0xff] }
   0x3   :  { %87 = vmatpush.msra.mxu0 %v34_v0  ;;  %165 = vmatpush.msra.mxu1 %v34_v0  ;;  %v28_v6 = vld [vmem:[%s328_s1 + $0x8] sm:$0xff]  ;;  %v27_v7 = vld [vmem:[%s328_s1] sm:$0xff]  ;;  %v20_v8 = vld [vmem:[%s330_s0 + $0x30] sm:$0xff] }
   0x4   :  { %169 = vmatpush.msra.mxu2 %v33_v1  ;;  %170 = vmatpush.msra.mxu3 %v33_v1  ;;  %v24_v9 = vld [vmem:[%s330_s0 + $0x50] sm:$0xff]  ;;  %v14_v10 = vld [vmem:[%s330_s0] sm:$0xff]  ;;  %v17_v11 = vld [vmem:[%s330_s0 + $0x18] sm:$0xff] }
   0x5   :  { %88 = vmatpush.msra.mxu0 %v33_v1  ;;  %168 = vmatpush.msra.mxu1 %v33_v1  ;;  %v21_v12 = vld [vmem:[%s330_s0 + $0x38] sm:$0xff]  ;;  %v15_v14 = vld [vmem:[%s330_s0 + $0x8] sm:$0xff]  ;;  %v18_v15 = vld [vmem:[%s330_s0 + $0x20] sm:$0xff] }
   0x6   :  { %172 = vmatpush.msra.mxu2 %v32_v2  ;;  %173 = vmatpush.msra.mxu3 %v32_v2  ;;  %v25_v13 = vld [vmem:[%s330_s0 + $0x58] sm:$0xff]  ;;  %v22_v16 = vld [vmem:[%s330_s0 + $0x40] sm:$0xff]  ;;  %v16_v18 = vld [vmem:[%s330_s0 + $0x10] sm:$0xff] }
   0x7   :  { %89 = vmatpush.msra.mxu0 %v32_v2  ;;  %171 = vmatpush.msra.mxu1 %v32_v2  ;;  %v26_v17 = vld [vmem:[%s330_s0 + $0x60] sm:$0x3]  ;;  %v19_v19 = vld [vmem:[%s330_s0 + $0x28] sm:$0xff] }
   0x8   :  { %175 = vmatpush.msra.mxu2 %v31_v3  ;;  %176 = vmatpush.msra.mxu3 %v31_v3  ;;  %v23_v20 = vld [vmem:[%s330_s0 + $0x48] sm:$0xff]  ;;  %v189_v21 = vld [vmem:[%s329_s2] ss:$0 sm:$0xff] }
   0x9   :  { %90 = vmatpush.msra.mxu0 %v31_v3  ;;  %174 = vmatpush.msra.mxu1 %v31_v3 }
   0xa   :  { %178 = vmatpush.msra.mxu2 %v30_v4  ;;  %179 = vmatpush.msra.mxu3 %v30_v4 }
   0xb   :  { %91 = vmatpush.msra.mxu0 %v30_v4  ;;  %177 = vmatpush.msra.mxu1 %v30_v4 }
   0xc   :  { %181 = vmatpush.msra.mxu2 %v29_v5  ;;  %182 = vmatpush.msra.mxu3 %v29_v5 }
   0xd   :  { %92 = vmatpush.msra.mxu0 %v29_v5  ;;  %180 = vmatpush.msra.mxu1 %v29_v5 }
   0xe   :  { %184 = vmatpush.msra.mxu2 %v28_v6  ;;  %185 = vmatpush.msra.mxu3 %v28_v6 }
   0xf   :  { %93 = vmatpush.msra.mxu0 %v28_v6  ;;  %183 = vmatpush.msra.mxu1 %v28_v6 }
  0x10   :  { %187 = vmatpush.msra.mxu2 %v27_v7  ;;  %188 = vmatpush.msra.mxu3 %v27_v7 }
  0x11   :  { %158 = vmatmul.msk.f32.vlgmr.msra.gmra.mxu2 %vm39_vm0, %v20_v8  ;;  %162 = vmatmul.msk.f32.vlgmr.msra.gmra.mxu3 %vm39_vm0, %v24_v9 }
  0x12   :  { %94 = vmatpush.msra.mxu0 %v27_v7  ;;  %186 = vmatpush.msra.mxu1 %v27_v7 }
  0x13   :  { %152 = vmatmul.msk.f32.vlgmr.msra.gmra.mxu0 %vm39_vm0, %v14_v10  ;;  %155 = vmatmul.msk.f32.vlgmr.msra.gmra.mxu1 %vm39_vm0, %v17_v11 }
  0x19   :  { %159 = vmatmul.msk.f32.gmra.mxu2 %vm39_vm0, %v21_v12  ;;  %163 = vmatmul.msk.f32.gmra.mxu3 %vm39_vm0, %v25_v13 }
  0x1b   :  { %153 = vmatmul.msk.f32.gmra.mxu0 %vm39_vm0, %v15_v14  ;;  %156 = vmatmul.msk.f32.gmra.mxu1 %vm39_vm0, %v18_v15 }
  0x21   :  { %160 = vmatmul.msk.f32.gmra.mxu2 %vm39_vm0, %v22_v16  ;;  %164 = vmatmul.msk.f32.gmra.mxu3 %vm39_vm0, %v26_v17 }
  0x23   :  { %154 = vmatmul.msk.f32.gmra.mxu0 %vm39_vm0, %v16_v18  ;;  %157 = vmatmul.msk.f32.gmra.mxu1 %vm39_vm0, %v19_v19 }
  0x29   :  { %161 = vmatmul.msk.f32.gmra.mxu2 %vm39_vm0, %v23_v20 }
  0x90   :  { %v96_v22 = vpop.f32.mrf.mxu0  ;;  %v105_v23 = vpop.f32.mrf.mxu1 }
  0x91   :  { %v97_v24 = vadd.f32 %v189_v21, %v96_v22  ;;  %v106_v25 = vadd.f32 %v189_v21, %v105_v23 }
  0x93   :  { %135 = vst [vmem:[%s331_s3] sm:$0xff] %v97_v24 }
  0x94   :  { %v114_v26 = vpop.f32.mrf.mxu2  ;;  %138 = vst [vmem:[%s331_s3 + $0x18] sm:$0xff] %v106_v25  ;;  %v126_v27 = vpop.f32.mrf.mxu3 }
  0x95   :  { %v115_v28 = vadd.f32 %v189_v21, %v114_v26  ;;  %v127_v29 = vadd.f32 %v189_v21, %v126_v27 }
  0x97   :  { %141 = vst [vmem:[%s331_s3 + $0x30] sm:$0xff] %v115_v28 }
  0x98   :  { %145 = vst [vmem:[%s331_s3 + $0x50] sm:$0xff] %v127_v29  ;;  %v99_v30 = vpop.f32.mrf.mxu0  ;;  %v108_v31 = vpop.f32.mrf.mxu1 }
  0x99   :  { %v100_v32 = vadd.f32 %v189_v21, %v99_v30  ;;  %v109_v33 = vadd.f32 %v189_v21, %v108_v31 }
  0x9b   :  { %136 = vst [vmem:[%s331_s3 + $0x8] sm:$0xff] %v100_v32 }
  0x9c   :  { %v117_v34 = vpop.f32.mrf.mxu2  ;;  %139 = vst [vmem:[%s331_s3 + $0x20] sm:$0xff] %v109_v33  ;;  %v129_v35 = vpop.f32.mrf.mxu3 }
  0x9d   :  { %v118_v36 = vadd.f32 %v189_v21, %v117_v34  ;;  %v130_v37 = vadd.f32 %v189_v21, %v129_v35 }
  0x9f   :  { %142 = vst [vmem:[%s331_s3 + $0x38] sm:$0xff] %v118_v36 }
  0xa0   :  { %146 = vst [vmem:[%s331_s3 + $0x58] sm:$0xff] %v130_v37  ;;  %v102_v38 = vpop.f32.mrf.mxu0  ;;  %v111_v39 = vpop.f32.mrf.mxu1 }
  0xa1   :  { %v103_v40 = vadd.f32 %v189_v21, %v102_v38  ;;  %v112_v41 = vadd.f32 %v189_v21, %v111_v39 }
  0xa3   :  { %137 = vst [vmem:[%s331_s3 + $0x10] sm:$0xff] %v103_v40 }
  0xa4   :  { %v120_v42 = vpop.f32.mrf.mxu2  ;;  %140 = vst [vmem:[%s331_s3 + $0x28] sm:$0xff] %v112_v41  ;;  %v132_v43 = vpop.f32.mrf.mxu3 }
  0xa5   :  { %v121_v44 = vadd.f32 %v189_v21, %v120_v42  ;;  %v133_v45 = vadd.f32 %v189_v21, %v132_v43 }
  0xa7   :  { %143 = vst [vmem:[%s331_s3 + $0x40] sm:$0xff] %v121_v44 }
  0xa8   :  { %147 = vst [vmem:[%s331_s3 + $0x60] sm:$0x3] %v133_v45 }
  0xac   :  { %v123_v46 = vpop.f32.mrf.mxu2 }
  0xad   :  { %v124_v47 = vadd.f32 %v189_v21, %v123_v46 }
  0xaf   :  { %144 = vst [vmem:[%s331_s3 + $0x48] sm:$0xff] %v124_v47 }

</bundles_post_ra>
